<compile_context>
chip_gen: v7x
topology: tpu7x:2x2x1
jax: 0.10.0
libtpu: 0.0.40
codegen_flags: <defaults>
</compile_context>

<pallas_src>
import functools

import jax
import jax.numpy as jnp
from jax import lax
from jax.experimental import pallas as pl
from jax.experimental.pallas import tpu as pltpu


def _round_up(v, m):
    return (v + m - 1) // m * m


def _sublane_min(dtype):
    # f32 -> 8, bf16/f16 -> 16, int8/fp8 -> 32.
    return max(8, 32 // jnp.dtype(dtype).itemsize)


_NT_DIMS = (((1,), (1,)), ((), ()))  # contract last dim of x with last dim of W


def _kernel_kacc(x_ref, w_ref, *rest, w_mul, b_mul, has_bias, cast_dtype):
    # Multi-K-step path: grid (M, N, K), f32 accumulator scratch.
    if has_bias:
        b_ref, o_ref, acc_ref = rest
    else:
        o_ref, acc_ref = rest
    k = pl.program_id(2)

    @pl.when(k == 0)
    def _():
        acc_ref[...] = jnp.zeros_like(acc_ref)

    a = x_ref[...]
    w = w_ref[...]
    if cast_dtype is not None:
        a = a.astype(cast_dtype)
        w = w.astype(cast_dtype)
    acc_ref[...] += lax.dot_general(a, w, _NT_DIMS,
                                    preferred_element_type=jnp.float32)

    @pl.when(k == pl.num_programs(2) - 1)
    def _():
        out = acc_ref[...] * w_mul
        if has_bias:
            out = out + b_ref[...].astype(jnp.float32) * b_mul
        o_ref[...] = out.astype(o_ref.dtype)


def _kernel_single(x_ref, w_ref, *rest, w_mul, b_mul, has_bias, cast_dtype):
    # Single-K-step fast path: no accumulator, no pl.when, 2-D grid.
    if has_bias:
        b_ref, o_ref = rest
    else:
        (o_ref,) = rest
    a = x_ref[...]
    w = w_ref[...]
    if cast_dtype is not None:
        a = a.astype(cast_dtype)
        w = w.astype(cast_dtype)
    out = lax.dot_general(a, w, _NT_DIMS,
                          preferred_element_type=jnp.float32) * w_mul
    if has_bias:
        out = out + b_ref[...].astype(jnp.float32) * b_mul
    o_ref[...] = out.astype(o_ref.dtype)


def equalized_linear(x, weight, bias, *, w_mul, b_mul=1.0,
                     tm_max=256, tn_max=512, tk_max=1024,
                     cast_dtype=None):
    """EqualizedLinear forward: F.linear(x, weight * w_mul, bias * b_mul).

    x: (..., K)  weight: (N, K) (native layout)  bias: (N,) or None.
    `cast_dtype` optionally casts the matmul operands (e.g. jnp.bfloat16)
    inside the kernel while keeping f32 accumulation.
    """
    orig_shape = x.shape
    K = orig_shape[-1]
    N, Kw = weight.shape
    assert Kw == K
    x2 = x.reshape(-1, K)
    M = x2.shape[0]
    has_bias = bias is not None

    # --- tile selection -----------------------------------------------------
    sub = _sublane_min(x2.dtype)
    tm = min(_round_up(M, sub), tm_max)

    # Prefer a tk that covers K exactly (no K padding, single K step).
    k_aligned = _round_up(K, 128)
    tk = k_aligned if k_aligned <= tk_max else tk_max

    tn = min(_round_up(N, 128), tn_max)
    # Keep >=2 blocks along a parallel axis for 2-TC chips (v7x) when the
    # whole M fits in one tile.  Only split when it costs no extra padding.
    n_aligned = _round_up(N, 128)
    if _round_up(M, tm) // tm == 1 and n_aligned >= 256 and tn >= n_aligned:
        half = n_aligned // 2
        if half % 128 == 0:
            tn = half

    Mp, Np, Kp = _round_up(M, tm), _round_up(N, tn), _round_up(K, tk)

    # --- pad only when actually ragged ---------------------------------------
    if (Mp, Kp) == (M, K):
        xp = x2
    else:
        xp = jnp.zeros((Mp, Kp), x2.dtype).at[:M, :K].set(x2)
    if (Np, Kp) == (N, K):
        wp = weight                     # native (N, K): no transpose, no copy
    else:
        wp = jnp.zeros((Np, Kp), weight.dtype).at[:N, :K].set(weight)
    if has_bias:
        if Np == N:
            bp = bias.reshape(1, N)
        else:
            bp = jnp.zeros((1, Np), bias.dtype).at[0, :N].set(bias)

    # --- build grid / specs ---------------------------------------------------
    nk = Kp // tk
    operands = [xp, wp] + ([bp] if has_bias else [])

    if nk == 1:
        kernel = functools.partial(_kernel_single, w_mul=float(w_mul),
                                   b_mul=float(b_mul), has_bias=has_bias,
                                   cast_dtype=cast_dtype)
        grid = (Mp // tm, Np // tn)
        in_specs = [
            pl.BlockSpec((tm, tk), lambda i, j: (i, 0)),   # x tile (tm, K)
            pl.BlockSpec((tn, tk), lambda i, j: (j, 0)),   # W tile (tn, K)
        ]
        if has_bias:
            in_specs.append(pl.BlockSpec((1, tn), lambda i, j: (0, j)))
        out_specs = pl.BlockSpec((tm, tn), lambda i, j: (i, j))
        scratch_shapes = []
        dim_sem = ("parallel", "parallel")
    else:
        kernel = functools.partial(_kernel_kacc, w_mul=float(w_mul),
                                   b_mul=float(b_mul), has_bias=has_bias,
                                   cast_dtype=cast_dtype)
        grid = (Mp // tm, Np // tn, nk)
        in_specs = [
            pl.BlockSpec((tm, tk), lambda i, j, k: (i, k)),   # x tile
            pl.BlockSpec((tn, tk), lambda i, j, k: (j, k)),   # W tile (N,K)
        ]
        if has_bias:
            in_specs.append(pl.BlockSpec((1, tn), lambda i, j, k: (0, j)))
        out_specs = pl.BlockSpec((tm, tn), lambda i, j, k: (i, j))
        scratch_shapes = [pltpu.VMEM((tm, tn), jnp.float32)]
        dim_sem = ("parallel", "parallel", "arbitrary")

    out = pl.pallas_call(
        kernel,
        out_shape=jax.ShapeDtypeStruct((Mp, Np), x.dtype),
        grid_spec=pltpu.PrefetchScalarGridSpec(
            num_scalar_prefetch=0,
            grid=grid,
            in_specs=in_specs,
            out_specs=out_specs,
            scratch_shapes=scratch_shapes,
        ),
        compiler_params=pltpu.CompilerParams(
            dimension_semantics=dim_sem,
            vmem_limit_bytes=24 << 20),
    )(*operands)

    if (Mp, Np) != (M, N):
        out = out[:M, :N]
    return out.reshape(*orig_shape[:-1], N)


if __name__ == "__main__":
    # EqualizedLinear(input_size=32, output_size=64, gain=sqrt(2),
    #                 use_wscale=True, lrmul=1, bias=True)
    B, K, N = 2, 32, 64
    gain, lrmul = 2 ** 0.5, 1.0
    he_std = gain * K ** (-0.5)
    init_std = 1.0 / lrmul            # use_wscale=True
    w_mul = he_std * lrmul
    b_mul = lrmul

    key = jax.random.PRNGKey(0)
    kx, kw, kb = jax.random.split(key, 3)
    x = jax.random.normal(kx, (B, K), dtype=jnp.float32)
    weight = init_std * jax.random.normal(kw, (N, K), dtype=jnp.float32)
    # Module initializes bias to zeros; use small random values so the
    # b_mul path is actually exercised by the correctness check.
    bias = 0.1 * jax.random.normal(kb, (N,), dtype=jnp.float32)

    out = equalized_linear(x, weight, bias, w_mul=w_mul, b_mul=b_mul)
    out = jax.block_until_ready(out)
    ref = x @ (weight * w_mul).T + bias * b_mul
    assert out.shape == (B, N)
    assert jnp.allclose(out, ref, atol=1e-4, rtol=1e-4)

    # Non-tile-aligned, higher-rank input exercises the padding / reshape
    # path (F.linear semantics over leading dims).
    K2, N2 = 48, 72
    x2 = jax.random.normal(kx, (5, 3, K2), dtype=jnp.float32)
    w2 = jax.random.normal(kw, (N2, K2), dtype=jnp.float32)
    b2 = 0.05 * jax.random.normal(kb, (N2,), dtype=jnp.float32)
    w_mul2 = gain * K2 ** (-0.5)
    out2 = jax.block_until_ready(
        equalized_linear(x2, w2, b2, w_mul=w_mul2, b_mul=1.0))
    ref2 = x2 @ (w2 * w_mul2).T + b2
    assert out2.shape == (5, 3, N2)
    assert jnp.allclose(out2, ref2, atol=1e-4, rtol=1e-4)

    # Aligned, no-bias case: exercises the pad-free path and the specialized
    # has_bias=False kernel (EqualizedLinear(..., bias=False)).
    K3, N3, M3 = 128, 256, 8
    x3 = jax.random.normal(kx, (M3, K3), dtype=jnp.float32)
    w3 = jax.random.normal(kw, (N3, K3), dtype=jnp.float32)
    w_mul3 = gain * K3 ** (-0.5)
    out3 = jax.block_until_ready(
        equalized_linear(x3, w3, None, w_mul=w_mul3))
    ref3 = x3 @ (w3 * w_mul3).T
    assert out3.shape == (M3, N3)
    assert jnp.allclose(out3, ref3, atol=1e-4, rtol=1e-4)

    print("KERNEL_OK")
</pallas_src>

<mosaic_0001>
module attributes {stable_mosaic.version = 11 : i64} {
  func.func @_kernel_single(%arg0: i32, %arg1: i32, %arg2: memref<8x128xf32, #tpu.memory_space<vmem>>, %arg3: memref<128x128xf32, #tpu.memory_space<vmem>>, %arg4: memref<1x128xf32, #tpu.memory_space<vmem>>, %arg5: memref<8x128xf32, #tpu.memory_space<vmem>>) attributes {dimension_semantics = [#tpu.dimension_semantics<parallel>, #tpu.dimension_semantics<parallel>], iteration_bounds = array<i64: 1, 1>, scalar_prefetch = 0 : i64, scratch_operands = 0 : i64, tpu.core_type = #tpu.core_type<tc>, window_params = [{transform_indices = @transform_0, window_bounds = array<i64: 8, 128>}, {transform_indices = @transform_1, window_bounds = array<i64: 128, 128>}, {transform_indices = @transform_2, window_bounds = array<i64: 1, 128>}, {transform_indices = @transform_3, window_bounds = array<i64: 8, 128>}]} {
    %c0 = arith.constant 0 : index
    %c0_0 = arith.constant 0 : index
    %0 = vector.load %arg2[%c0, %c0_0] : memref<8x128xf32, #tpu.memory_space<vmem>>, vector<8x128xf32>
    %c0_1 = arith.constant 0 : index
    %c0_2 = arith.constant 0 : index
    %1 = vector.load %arg3[%c0_1, %c0_2] : memref<128x128xf32, #tpu.memory_space<vmem>>, vector<128x128xf32>
    %cst = arith.constant dense<0.000000e+00> : vector<8x128xf32>
    %2 = tpu.matmul %0, %1, %cst {dimension_numbers = #tpu.dot_dimension_numbers<[1], [1], [0], [0], [0, 0, 1, 0], [], []>} : vector<8x128xf32>, vector<128x128xf32>, vector<8x128xf32> -> vector<8x128xf32>
    %cst_3 = arith.constant 2.500000e-01 : f32
    %3 = vector.broadcast %cst_3 : f32 to vector<8x128xf32>
    %4 = arith.mulf %2, %3 : vector<8x128xf32>
    %c0_4 = arith.constant 0 : index
    %c0_5 = arith.constant 0 : index
    %5 = vector.load %arg4[%c0_4, %c0_5] : memref<1x128xf32, #tpu.memory_space<vmem>>, vector<1x128xf32>
    %cst_6 = arith.constant 1.000000e+00 : f32
    %6 = vector.broadcast %cst_6 : f32 to vector<1x128xf32>
    %7 = arith.mulf %5, %6 : vector<1x128xf32>
    %8 = vector.broadcast %7 : vector<1x128xf32> to vector<8x128xf32>
    %9 = arith.addf %4, %8 : vector<8x128xf32>
    %c0_7 = arith.constant 0 : index
    %c0_8 = arith.constant 0 : index
    %10 = vector.load %arg5[%c0_7, %c0_8] : memref<8x128xf32, #tpu.memory_space<vmem>>, vector<8x128xf32>
    tpu.vector_store %arg5[%c0_7, %c0_8], %9 {strides = array<i32>} : memref<8x128xf32, #tpu.memory_space<vmem>>, vector<8x128xf32>,
    return
  }
  func.func @transform_0(%arg0: i32, %arg1: i32) -> (i32, i32) {
    %c0_i32 = arith.constant 0 : i32
    %c0_i32_0 = arith.constant 0 : i32
    return %arg0, %c0_i32 : i32, i32
  }
  func.func @transform_1(%arg0: i32, %arg1: i32) -> (i32, i32) {
    %c0_i32 = arith.constant 0 : i32
    %c0_i32_0 = arith.constant 0 : i32
    return %arg1, %c0_i32 : i32, i32
  }
  func.func @transform_2(%arg0: i32, %arg1: i32) -> (i32, i32) {
    %c0_i32 = arith.constant 0 : i32
    %c0_i32_0 = arith.constant 0 : i32
    return %c0_i32, %arg1 : i32, i32
  }
  func.func @transform_3(%arg0: i32, %arg1: i32) -> (i32, i32) {
    %c0_i32 = arith.constant 0 : i32
    return %arg0, %arg1 : i32, i32
  }
}

</mosaic_0001>

<bundles_post_ra>
// kernel: tpu_custom_call.1
= control target key start
LH: loop header
LB: loop body
LE: loop exit
PB: predicated region body
PF: predicated region fallthrough
CT: control target
= control target key end

     0   :  { %8 = vsyncpa [#allocation3], 0  ;;  %s385_s0 = inlined_call_operand.hbm [shape: f32[8,128], index: 0, kind: input, shape index: {}]   ;;  %s386_s1 = inlined_call_operand.hbm [shape: f32[128,128], index: 1, kind: input, shape index: {}]   ;;  %s387_s2 = inlined_call_operand.vmem [shape: f32[1,128], index: 2, kind: input, shape index: {}]   ;;  %s388_s3 = inlined_call_operand.hbm [shape: f32[8,128], index: 3, kind: output, shape index: {}]  }
   0x1   :  { %9 = vsyncpa [#allocation6], 0 }
   0x2   :  { %10 = vsyncpa [#allocation4], 0  ;;  %s311_s12 = smov [#allocation2]   ;;  %s312_s14 = smov [#allocation5]  }
   0x3   :  { %s17_s13 = sshll.u32 %s311_s12, 4  ;;  %s26_s15 = sshll.u32 %s312_s14, 4  ;;  %s18_s13 = int_to_ptr.vmem [resolvable:$true] %s17_s13  ;;  %s339_s15 = int_to_ptr.vmem [resolvable:$true] %s26_s15 }
   0x4   :  { %s239_s18 = scalar_lea.hbm %s385_s0, 128 }
   0x5   :  { %p240_p0 = scmp.ne.s32.totalorder %s385_s0, %s239_s18  ;;  %p243_p1 = scmp.lt.u32.totalorder %s239_s18, %s385_s0 }
   0x7   :  { %p245_p2 = pnand %p243_p1, %p240_p0 }
   0x9   :  { %248 = shalt.err (!%p245_p2)
}
   0xa   :  { %s249_s23 = scalar_lea.vmem %s18_s13, 128  ;;  %p254_p4 = scmp.lt.s32.totalorder %s18_s13, %s18_s13 }
   0xb   :  { %p250_p3 = scmp.ne.s32.totalorder %s18_s13, %s249_s23  ;;  %p255_p5 = scmp.lt.s32.totalorder %s249_s23, %s249_s23 }
   0xd   :  { %p256_p6 = por %p255_p5, %p254_p4 }
   0xf   :  { %p257_p7 = pnand %p256_p6, %p250_p3 }
  0x11   :  { %260 = shalt.err (!%p257_p7)
}
  0x12   :  { %20 = dma.hbm_to_vmem [thread:$0]  %s385_s0, 128, %s18_s13, [#allocation3]  }
  0x13   :  { %s261_s28 = scalar_lea.hbm %s386_s1, 2048 }
  0x14   :  { %p262_p8 = scmp.ne.s32.totalorder %s386_s1, %s261_s28  ;;  %p265_p9 = scmp.lt.u32.totalorder %s261_s28, %s386_s1 }
  0x16   :  { %p267_p10 = pnand %p265_p9, %p262_p8 }
  0x18   :  { %270 = shalt.err (!%p267_p10)
}
  0x19   :  { %s271_s6 = scalar_lea.vmem %s339_s15, 2048  ;;  %p276_p12 = scmp.lt.s32.totalorder %s339_s15, %s339_s15 }
  0x1a   :  { %p272_p11 = scmp.ne.s32.totalorder %s339_s15, %s271_s6  ;;  %p277_p13 = scmp.lt.s32.totalorder %s271_s6, %s271_s6 }
  0x1c   :  { %p278_p0 = por %p277_p13, %p276_p12 }
  0x1e   :  { %p279_p1 = pnand %p278_p0, %p272_p11 }
  0x20   :  { %282 = shalt.err (!%p279_p1)
}
  0x21   :  { %s313_s0 = smov 128   ;;  %s314_s7 = smov 8  }
  0x22   :  { %32 = dma.hbm_to_vmem [thread:$0]  %s386_s1, 2048, %s339_s15, [#allocation6], %s313_s0, %s313_s0, %s314_s7  }
  0x23   :  { %305 = dma.done.wait [#allocation3], 128  }
  0x24   :  { %306 = vsyncadd [#allocation3], 4294967168 }
  0x25   :  { %307 = dma.done.wait [#allocation6], 2048  }
  0x26   :  { %308 = vsyncadd [#allocation6], 4294965248  ;;  %v315_v0 = vmov 0.0|0.0   ;;  %vm316_vm0 = vmmov 0   ;;  %v317_v1 = vmov 0.0   ;;  %v42_v2 = vld [vmem:[#allocation5] sm:$0xff] }
  0x27   :  { %207 = vmatprep.subr.bf16.mxu0 %v315_v0  ;;  %204 = vmatprep.mubr.msk.f32.mxu0 %vm316_vm0, %v317_v1  ;;  %v43_v3 = vld [vmem:[#allocation5 + $0x8] sm:$0xff]  ;;  %v44_v5 = vld [vmem:[#allocation5 + $0x10] sm:$0xff]  ;;  %v45_v6 = vld [vmem:[#allocation5 + $0x18] sm:$0xff]  ;;  %s318_s11 = smov [#allocation7]  }
  0x28   :  { %v208_v4 = vpack.c.bf16 %v43_v3, %v42_v2  ;;  %v211_v7 = vpack.c.bf16 %v45_v6, %v44_v5  ;;  %v46_v8 = vld [vmem:[#allocation5 + $0x20] sm:$0xff]  ;;  %v47_v9 = vld [vmem:[#allocation5 + $0x28] sm:$0xff]  ;;  %v48_v11 = vld [vmem:[#allocation5 + $0x30] sm:$0xff]  ;;  %s144_s12 = sshll.u32 %s318_s11, 4  ;;  %s145_s12 = int_to_ptr.vmem [resolvable:$true] %s144_s12 }
  0x29   :  { %v214_v10 = vpack.c.bf16 %v47_v9, %v46_v8  ;;  %v49_v12 = vld [vmem:[#allocation5 + $0x38] sm:$0xff]  ;;  %v50_v14 = vld [vmem:[#allocation5 + $0x40] sm:$0xff]  ;;  %v51_v15 = vld [vmem:[#allocation5 + $0x48] sm:$0xff]  ;;  %s283_s13 = scalar_lea.vmem %s145_s12, 128  ;;  %p288_p3 = scmp.lt.s32.totalorder %s145_s12, %s145_s12 }
  0x2a   :  { %209 = vmatpush3.bf16.xpose.msra.mxu0 %v208_v4  ;;  %v217_v13 = vpack.c.bf16 %v49_v12, %v48_v11  ;;  %v220_v16 = vpack.c.bf16 %v51_v15, %v50_v14  ;;  %v52_v17 = vld [vmem:[#allocation5 + $0x50] sm:$0xff]  ;;  %v53_v18 = vld [vmem:[#allocation5 + $0x58] sm:$0xff]  ;;  %v54_v20 = vld [vmem:[#allocation5 + $0x60] sm:$0xff]  ;;  %p284_p2 = scmp.ne.s32.totalorder %s145_s12, %s283_s13  ;;  %p289_p4 = scmp.lt.s32.totalorder %s283_s13, %s283_s13 }
  0x2b   :  { %210 = vmatprep.subr.bf16.mxu0 %v315_v0  ;;  %v223_v19 = vpack.c.bf16 %v53_v18, %v52_v17  ;;  %v55_v21 = vld [vmem:[#allocation5 + $0x68] sm:$0xff]  ;;  %v56_v23 = vld [vmem:[#allocation5 + $0x70] sm:$0xff]  ;;  %v57_v24 = vld [vmem:[#allocation5 + $0x78] sm:$0xff] }
  0x2c   :  { %v226_v22 = vpack.c.bf16 %v55_v21, %v54_v20  ;;  %v229_v25 = vpack.c.bf16 %v57_v24, %v56_v23  ;;  %v41_v26 = vld [vmem:[#allocation2] sm:$0xff]  ;;  %p290_p5 = por %p289_p4, %p288_p3 }
  0x2d   :  { %v154_v28 = vld [vmem:[%s387_s2] ss:$0 sm:$0xff] }
  0x2e   :  { %p291_p6 = pnand %p290_p5, %p284_p2 }
  0x32   :  { %212 = vmatpush3.bf16.xpose.msra.mxu0 %v211_v7 }
  0x33   :  { %213 = vmatprep.subr.bf16.mxu0 %v315_v0 }
  0x3a   :  { %215 = vmatpush3.bf16.xpose.msra.mxu0 %v214_v10 }
  0x3b   :  { %216 = vmatprep.subr.bf16.mxu0 %v315_v0 }
  0x42   :  { %218 = vmatpush3.bf16.xpose.msra.mxu0 %v217_v13 }
  0x43   :  { %219 = vmatprep.subr.bf16.mxu0 %v315_v0 }
  0x4a   :  { %221 = vmatpush3.bf16.xpose.msra.mxu0 %v220_v16 }
  0x4b   :  { %222 = vmatprep.subr.bf16.mxu0 %v315_v0 }
  0x52   :  { %224 = vmatpush3.bf16.xpose.msra.mxu0 %v223_v19 }
  0x53   :  { %225 = vmatprep.subr.bf16.mxu0 %v315_v0 }
  0x5a   :  { %227 = vmatpush3.bf16.xpose.msra.mxu0 %v226_v22 }
  0x5b   :  { %228 = vmatprep.subr.bf16.mxu0 %v315_v0 }
  0x62   :  { %230 = vmatpush3.bf16.xpose.msra.mxu0 %v229_v25 }
  0x69   :  { %205 = vmatmul.mubr.f32.vlgmr.msra.gmra.mrb[0].mxu0 %v41_v26 }
 0x13c   :  { %v124_v27 = vpop.f32.mrb[0].mxu0 }
 0x13d   :  { %v128_v29 = vmul.f32 0.25, %v124_v27  ;;  %v206_v30 = vpop.f32.mrb[1].mxu0 }
 0x13f   :  { %v136_v31 = vadd.f32 %v154_v28, %v128_v29 }
 0x141   :  { %137 = vst [vmem:[#allocation7] sm:$0xff] %v136_v31 }
 0x142   :  { %294 = shalt.err (!%p291_p6)
}
 0x143   :  { %s295_s16 = scalar_lea.hbm %s388_s3, 128 }
 0x144   :  { %p296_p7 = scmp.ne.s32.totalorder %s388_s3, %s295_s16  ;;  %p299_p8 = scmp.lt.u32.totalorder %s295_s16, %s388_s3 }
 0x146   :  { %p301_p9 = pnand %p299_p8, %p296_p7 }
 0x148   :  { %304 = shalt.err (!%p301_p9)
}
 0x149   :  { %147 = dma.vmem_to_hbm [thread:$0]  %s145_s12, 128, %s388_s3, [#allocation4]  }
 0x14a   :  { %309 = dma.done.wait [#allocation4], 128  }
 0x14b   :  { %310 = vsyncadd [#allocation4], 4294967168 }
 0x14c   :  { %151 = vsyncpa [#allocation3], 1 }
 0x14d   :  { %152 = vsyncpa [#allocation6], 1 }
 0x14e   :  { %153 = vsyncpa [#allocation4], 1 }

</bundles_post_ra>
